<compile_context>
chip_gen: v5e
topology: v5e:2x2
jax: 0.10.0
libtpu: 0.0.40
codegen_flags: <defaults>
</compile_context>

<pallas_src>
import jax
import jax.numpy as jnp
from jax import lax
from jax.experimental import pallas as pl
from jax.experimental.pallas import tpu as pltpu


# ----------------------------- host-side prep -----------------------------

def _fold_cd_weight(weight_oihw):
    """OIHW -> HWIO, fold the central-difference term into the centre tap.

    conv(x, W, pad=1) - conv(x, W.sum(2,3)[..,None,None], pad=0)
      == conv(x, W')  with  W'[1,1] = W[1,1] - W.sum over taps.
    The bias cancels exactly, so it is not needed at all.
    """
    w_hwio = jnp.transpose(weight_oihw, (2, 3, 1, 0)).astype(jnp.float32)  # (3,3,Cin,Cout)
    return w_hwio.at[1, 1].add(-jnp.sum(w_hwio, axis=(0, 1)))


def _build_toeplitz(w_fold_hwio, W, compute_dtype):
    """Row-Toeplitz weight, pre-concatenated along K: (3*W*Cin, W*Cout).

    toe[kh, wc*Cin+ci, wo*Cout+co] = w_fold[kh, wc-wo+1, ci, co] for
    |wc-wo| <= 1, else 0 (this also encodes the zero W-padding).
    """
    Cin, Cout = w_fold_hwio.shape[2], w_fold_hwio.shape[3]
    wc = jnp.arange(W)[:, None]            # input column
    wo = jnp.arange(W)[None, :]            # output column
    kw = wc - wo + 1                       # horizontal tap index
    valid = (kw >= 0) & (kw <= 2)
    kw = jnp.clip(kw, 0, 2)
    toe = jnp.where(valid[None, :, :, None, None], w_fold_hwio[:, kw], 0.0)  # (3,W,W,Cin,Cout)
    toe = jnp.transpose(toe, (0, 1, 3, 2, 4)).reshape(3 * W * Cin, W * Cout)
    return toe.astype(compute_dtype)


def _pick_batch_tile(N, H, target_rows=256):
    """Largest divisor of N with B*H <= target_rows (keeps vreg pressure sane)."""
    best = 1
    for b in range(1, N + 1):
        if N % b == 0 and b * H <= target_rows:
            best = b
    return best


# ------------------------------- Pallas core -------------------------------

def cdconv_norm_act_nhwc(x_nhwc, weight_oihw, bias=None, *,
                         compute_dtype=jnp.bfloat16, out_dtype=None,
                         batch_tile=None):
    """Forward of CDConvNormAct(norm='none', act='relu') on NHWC input.

    `bias` is accepted for interface fidelity but is unused: it cancels
    exactly in (conv - conv_diff) before the ReLU.
    """
    del bias  # provably cancels
    N, H, W, Cin = x_nhwc.shape
    Cout = weight_oihw.shape[0]
    out_dtype = out_dtype or x_nhwc.dtype
    WC, WOC = W * Cin, W * Cout

    # Folded + Toeplitz weight (runs once per parameter set).
    wt = _build_toeplitz(_fold_cd_weight(weight_oihw), W, compute_dtype)  # (3*WC, WOC)

    B = batch_tile if batch_tile is not None else _pick_batch_tile(N, H)
    assert N % B == 0, "batch tile must divide N"
    m_rows = B * H                 # valid output rows per grid step
    m_slab = B * (H + 2) - 2       # matmul M (includes 2 junk rows per boundary)

    # Lane-dense row view of the NHWC input: free reshape (contiguous).
    x_rows = x_nhwc.reshape(N * H, WC)

    def kernel(x_ref, wt_ref, o_ref, pad_ref):
        # x_ref  : (B*H, W*Cin)        rows of B batch elements (input dtype)
        # wt_ref : (3*W*Cin, W*Cout)   K-concatenated Toeplitz weight (resident)
        # o_ref  : (B*H, W*Cout)       lane-dense output rows
        # pad_ref: VMEM (B*(H+2), W*Cin) zero-separated padded slab

        # Zero border/separator rows written once; scratch persists across
        # grid steps and data rows are fully re-written every step.
        @pl.when(pl.program_id(0) == 0)
        def _():
            pad_ref[...] = jnp.zeros_like(pad_ref)

        # Cast in VMEM (saves a host-side HBM cast pass) and scatter each
        # element's H rows into its padded window (static unroll, B small).
        xb = x_ref[...].astype(compute_dtype)
        for b in range(B):
            pad_ref[b * (H + 2) + 1: b * (H + 2) + 1 + H, :] = xb[b * H:(b + 1) * H, :]

        # One deep MXU matmul: concat the 3 kh row-windows along K.
        a = jnp.concatenate(
            [pad_ref[kh:kh + m_slab, :] for kh in range(3)], axis=1)     # (m_slab, 3*WC)
        acc = jnp.dot(a, wt_ref[...], preferred_element_type=jnp.float32)
        out = jnp.maximum(acc, 0.0)                                      # ReLU, f32 epilogue

        # Drop the 2 junk rows per element boundary when storing.
        for b in range(B):
            o_ref[b * H:(b + 1) * H, :] = (
                out[b * (H + 2):b * (H + 2) + H, :].astype(o_ref.dtype))

    out_rows = pl.pallas_call(
        kernel,
        out_shape=jax.ShapeDtypeStruct((N * H, WOC), out_dtype),
        grid_spec=pltpu.PrefetchScalarGridSpec(
            num_scalar_prefetch=0,
            grid=(N // B,),
            in_specs=[
                pl.BlockSpec((m_rows, WC), lambda i: (i, 0)),
                pl.BlockSpec((3 * WC, WOC), lambda i: (0, 0)),   # resident weight
            ],
            out_specs=pl.BlockSpec((m_rows, WOC), lambda i: (i, 0)),
            scratch_shapes=[pltpu.VMEM((B * (H + 2), WC), compute_dtype)],
        ),
        compiler_params=pltpu.CompilerParams(
            dimension_semantics=("parallel",),
            vmem_limit_bytes=32 * 1024 * 1024,
        ),
    )(x_rows, wt)

    return out_rows.reshape(N, H, W, Cout)


def cdconv_norm_act(x_nchw, weight_oihw, bias=None, *, compute_dtype=jnp.bfloat16):
    """NCHW wrapper matching the PyTorch module's I/O convention.

    NOTE: the two transposes here are pure interface plumbing; keep the
    surrounding model NHWC and call `cdconv_norm_act_nhwc` to avoid them.
    """
    x_nhwc = jnp.transpose(x_nchw, (0, 2, 3, 1))
    y_nhwc = cdconv_norm_act_nhwc(x_nhwc, weight_oihw, bias,
                                  compute_dtype=compute_dtype)
    return jnp.transpose(y_nhwc, (0, 3, 1, 2))


# -------------------------------- references --------------------------------

def _reference(x_nchw, weight_oihw, bias):
    """Pure-JAX reference mirroring the PyTorch forward exactly (f32)."""
    dn = ("NCHW", "OIHW", "NCHW")
    out = lax.conv_general_dilated(x_nchw, weight_oihw, (1, 1), ((1, 1), (1, 1)),
                                   dimension_numbers=dn,
                                   precision=lax.Precision.HIGHEST)
    out = out + bias[None, :, None, None]
    kernel_diff = jnp.sum(weight_oihw, axis=(2, 3))[:, :, None, None]
    out_diff = lax.conv_general_dilated(x_nchw, kernel_diff, (1, 1), ((0, 0), (0, 0)),
                                        dimension_numbers=dn,
                                        precision=lax.Precision.HIGHEST)
    out_diff = out_diff + bias[None, :, None, None]
    return jnp.maximum(out - out_diff, 0.0)


def _reference_folded_bf16(x_nchw, weight_oihw):
    """Folded-weight reference with bf16-rounded operands (for the bf16 path)."""
    w_fold = weight_oihw.at[:, :, 1, 1].add(-jnp.sum(weight_oihw, axis=(2, 3)))
    xb = x_nchw.astype(jnp.bfloat16).astype(jnp.float32)
    wb = w_fold.astype(jnp.bfloat16).astype(jnp.float32)
    dn = ("NCHW", "OIHW", "NCHW")
    out = lax.conv_general_dilated(xb, wb, (1, 1), ((1, 1), (1, 1)),
                                   dimension_numbers=dn,
                                   precision=lax.Precision.HIGHEST)
    return jnp.maximum(out, 0.0)


# ----------------------------------- main -----------------------------------

if __name__ == "__main__":
    key = jax.random.PRNGKey(0)
    k_x, k_w, k_b = jax.random.split(key, 3)

    N, Cin, Cout, H, W = 2, 4, 8, 16, 16
    x = jax.random.normal(k_x, (N, Cin, H, W), dtype=jnp.float32)
    # Deterministic conv parameters (shapes from nn.Conv2d(input_c, output_c, 3)).
    fan_in = Cin * 3 * 3
    bound = 1.0 / (fan_in ** 0.5)
    weight = jax.random.uniform(k_w, (Cout, Cin, 3, 3), jnp.float32,
                                minval=-bound, maxval=bound)
    bias = jax.random.uniform(k_b, (Cout,), jnp.float32,
                              minval=-bound, maxval=bound)

    fwd = jax.jit(cdconv_norm_act, static_argnames=("compute_dtype",))

    # 1) f32 compute path: exact-semantics check against the PyTorch math.
    y32 = jax.block_until_ready(fwd(x, weight, bias, compute_dtype=jnp.float32))
    y_ref = _reference(x, weight, bias)
    assert y32.shape == (N, Cout, H, W)
    assert jnp.allclose(y32, y_ref, atol=1e-3, rtol=1e-3), "f32 mismatch vs reference"

    # 2) bf16 compute path (default, MXU-native): check against a bf16-input
    #    reference of the algebraically folded conv.
    ybf = jax.block_until_ready(fwd(x, weight, bias))
    y_ref_bf = _reference_folded_bf16(x, weight)
    assert ybf.shape == (N, Cout, H, W)
    assert jnp.allclose(ybf, y_ref_bf, atol=2e-2, rtol=2e-2), "bf16 mismatch vs reference"

    print("KERNEL_OK")
</pallas_src>

<mosaic_0001>
module attributes {stable_mosaic.version = 11 : i64} {
  func.func @kernel(%arg0: i32, %arg1: memref<32x64xf32, #tpu.memory_space<vmem>>, %arg2: memref<192x128xf32, #tpu.memory_space<vmem>>, %arg3: memref<32x128xf32, #tpu.memory_space<vmem>>, %arg4: memref<36x64xf32, #tpu.memory_space<vmem>>) attributes {dimension_semantics = [#tpu.dimension_semantics<parallel>], iteration_bounds = array<i64: 1>, scalar_prefetch = 0 : i64, scratch_operands = 1 : i64, tpu.core_type = #tpu.core_type<tc>, window_params = [{transform_indices = @transform_0, window_bounds = array<i64: 32, 64>}, {pipeline_mode = #tpu.pipeline_mode<synchronous>, transform_indices = @transform_1, window_bounds = array<i64: 192, 128>}, {transform_indices = @transform_2, window_bounds = array<i64: 32, 128>}]} {
    %c0_i32 = arith.constant 0 : i32
    %0 = arith.cmpi eq, %arg0, %c0_i32 : i32
    %1 = arith.extui %0 : i1 to i32
    %c0_i32_0 = arith.constant 0 : i32
    %2 = arith.cmpi ne, %1, %c0_i32_0 : i32
    scf.if %2 {
      %cst_15 = arith.constant 0.000000e+00 : f32
      %20 = vector.broadcast %cst_15 : f32 to vector<36x64xf32>
      %c0_16 = arith.constant 0 : index
      %c0_17 = arith.constant 0 : index
      %21 = vector.load %arg4[%c0_16, %c0_17] : memref<36x64xf32, #tpu.memory_space<vmem>>, vector<36x64xf32>
      tpu.vector_store %arg4[%c0_16, %c0_17], %20 {strides = array<i32>} : memref<36x64xf32, #tpu.memory_space<vmem>>, vector<36x64xf32>,
    } else {
    }
    %c0 = arith.constant 0 : index
    %c0_1 = arith.constant 0 : index
    %3 = vector.load %arg1[%c0, %c0_1] : memref<32x64xf32, #tpu.memory_space<vmem>>, vector<32x64xf32>
    %4 = vector.extract_strided_slice %3 {offsets = [0, 0], sizes = [16, 64], strides = [1, 1]} : vector<32x64xf32> to vector<16x64xf32>
    %c1 = arith.constant 1 : index
    %c0_2 = arith.constant 0 : index
    %5 = vector.load %arg4[%c1, %c0_2] : memref<36x64xf32, #tpu.memory_space<vmem>>, vector<16x64xf32>
    tpu.vector_store %arg4[%c1, %c0_2], %4 {strides = array<i32>} : memref<36x64xf32, #tpu.memory_space<vmem>>, vector<16x64xf32>,
    %6 = vector.extract_strided_slice %3 {offsets = [16, 0], sizes = [16, 64], strides = [1, 1]} : vector<32x64xf32> to vector<16x64xf32>
    %c19 = arith.constant 19 : index
    %c0_3 = arith.constant 0 : index
    %7 = vector.load %arg4[%c19, %c0_3] : memref<36x64xf32, #tpu.memory_space<vmem>>, vector<16x64xf32>
    tpu.vector_store %arg4[%c19, %c0_3], %6 {strides = array<i32>} : memref<36x64xf32, #tpu.memory_space<vmem>>, vector<16x64xf32>,
    %c0_4 = arith.constant 0 : index
    %c0_5 = arith.constant 0 : index
    %8 = vector.load %arg4[%c0_4, %c0_5] : memref<36x64xf32, #tpu.memory_space<vmem>>, vector<34x64xf32>
    %c1_6 = arith.constant 1 : index
    %c0_7 = arith.constant 0 : index
    %9 = vector.load %arg4[%c1_6, %c0_7] : memref<36x64xf32, #tpu.memory_space<vmem>>, vector<34x64xf32>
    %c2 = arith.constant 2 : index
    %c0_8 = arith.constant 0 : index
    %10 = vector.load %arg4[%c2, %c0_8] : memref<36x64xf32, #tpu.memory_space<vmem>>, vector<34x64xf32>
    %11 = tpu.concatenate %8, %9, %10 in 1 : vector<34x64xf32>, vector<34x64xf32>, vector<34x64xf32> -> vector<34x192xf32>
    %c0_9 = arith.constant 0 : index
    %c0_10 = arith.constant 0 : index
    %12 = vector.load %arg2[%c0_9, %c0_10] : memref<192x128xf32, #tpu.memory_space<vmem>>, vector<192x128xf32>
    %cst = arith.constant dense<0.000000e+00> : vector<34x128xf32>
    %13 = tpu.matmul %11, %12, %cst {dimension_numbers = #tpu.dot_dimension_numbers<[1], [0], [0], [1], [0, 0, 1, 1], [], []>} : vector<34x192xf32>, vector<192x128xf32>, vector<34x128xf32> -> vector<34x128xf32>
    %cst_11 = arith.constant 0.000000e+00 : f32
    %14 = vector.broadcast %cst_11 : f32 to vector<34x128xf32>
    %15 = arith.maximumf %13, %14 : vector<34x128xf32>
    %16 = vector.extract_strided_slice %15 {offsets = [0, 0], sizes = [16, 128], strides = [1, 1]} : vector<34x128xf32> to vector<16x128xf32>
    %c0_12 = arith.constant 0 : index
    %c0_13 = arith.constant 0 : index
    %17 = vector.load %arg3[%c0_12, %c0_13] : memref<32x128xf32, #tpu.memory_space<vmem>>, vector<16x128xf32>
    tpu.vector_store %arg3[%c0_12, %c0_13], %16 {strides = array<i32>} : memref<32x128xf32, #tpu.memory_space<vmem>>, vector<16x128xf32>,
    %18 = vector.extract_strided_slice %15 {offsets = [18, 0], sizes = [16, 128], strides = [1, 1]} : vector<34x128xf32> to vector<16x128xf32>
    %c16 = arith.constant 16 : index
    %c0_14 = arith.constant 0 : index
    %19 = vector.load %arg3[%c16, %c0_14] : memref<32x128xf32, #tpu.memory_space<vmem>>, vector<16x128xf32>
    tpu.vector_store %arg3[%c16, %c0_14], %18 {strides = array<i32>} : memref<32x128xf32, #tpu.memory_space<vmem>>, vector<16x128xf32>,
    return
  }
  func.func @transform_0(%arg0: i32) -> (i32, i32) {
    %c0_i32 = arith.constant 0 : i32
    %c0_i32_0 = arith.constant 0 : i32
    return %arg0, %c0_i32 : i32, i32
  }
  func.func @transform_1(%arg0: i32) -> (i32, i32) {
    %c0_i32 = arith.constant 0 : i32
    %c0_i32_0 = arith.constant 0 : i32
    %c0_i32_1 = arith.constant 0 : i32
    return %c0_i32, %c0_i32_0 : i32, i32
  }
  func.func @transform_2(%arg0: i32) -> (i32, i32) {
    %c0_i32 = arith.constant 0 : i32
    %c0_i32_0 = arith.constant 0 : i32
    return %arg0, %c0_i32 : i32, i32
  }
}

</mosaic_0001>

<bundles_post_ra>
// kernel: cdconv_norm_act.1
= control target key start
LH: loop header
LB: loop body
LE: loop exit
PB: predicated region body
PF: predicated region fallthrough
CT: control target
= control target key end

     0   :  { %vm15_vm0 = vcmask 523264   ;;  %v237_v0 = vmov 0.0   ;;  %vm20_vm1 = vcmask 519168   ;;  %s238_s10 = smov 64   ;;  %s374_s0 = inlined_call_operand.vmem [shape: f32[32,64], index: 0, kind: input, shape index: {}]   ;;  %s375_s1 = inlined_call_operand.vmem [shape: f32[192,128], index: 1, kind: input, shape index: {}]   ;;  %s376_s2 = inlined_call_operand.vmem [shape: f32[32,128], index: 2, kind: output, shape index: {}]  }
   0x1   :  { %16 = vst.msk [vmem:[#allocation2] sm:$0xff] %vm15_vm0, %v237_v0  ;;  %v22_v1 = vld [vmem:[%s374_s0] sm:$0xff]  ;;  %v86_v2 = vld [vmem:[%s375_s1 + $0x78] sm:$0xff]  ;;  %v85_v3 = vld [vmem:[%s375_s1 + $0x70] sm:$0xff] }
   0x2   :  { %17 = vst.msk [vmem:[#allocation2 + $0x8] sm:$0xff] %vm15_vm0, %v237_v0  ;;  %110 = vmatpush.msra.mxu0 %v86_v2  ;;  %v94_v4 = vld [vmem:[%s375_s1 + $0xb8] sm:$0xff]  ;;  %193 = vmatpush.msra.mxu2 %v86_v2  ;;  %v93_v5 = vld [vmem:[%s375_s1 + $0xb0] sm:$0xff]  ;;  %v23_v6 = vld [vmem:[%s374_s0 + $0x8] sm:$0xff] }
   0x3   :  { %27 = vst.msk [vmem:[#allocation2 + $0x1] sm:$0xff] %vm15_vm0, %v22_v1  ;;  %150 = vmatpush.msra.mxu1 %v94_v4  ;;  %194 = vmatpush.msra.mxu3 %v86_v2  ;;  %v84_v7 = vld [vmem:[%s375_s1 + $0x68] sm:$0xff]  ;;  %v24_v8 = vld [vmem:[%s374_s0 + $0x10] sm:$0xff]  ;;  %v25_v10 = vld [vmem:[%s374_s0 + $0x18] sm:$0xff] }
   0x4   :  { %18 = vst.msk [vmem:[#allocation2 + $0x10] sm:$0xff] %vm15_vm0, %v237_v0  ;;  %111 = vmatpush.msra.mxu0 %v85_v3  ;;  %195 = vmatpush.msra.mxu2 %v85_v3  ;;  %v92_v9 = vld [vmem:[%s375_s1 + $0xa8] sm:$0xff]  ;;  %v83_v11 = vld [vmem:[%s375_s1 + $0x60] sm:$0xff]  ;;  %v82_v13 = vld [vmem:[%s375_s1 + $0x58] sm:$0xff] }
   0x5   :  { %19 = vst.msk [vmem:[#allocation2 + $0x18] sm:$0xff] %vm15_vm0, %v237_v0  ;;  %151 = vmatpush.msra.mxu1 %v93_v5  ;;  %196 = vmatpush.msra.mxu3 %v85_v3  ;;  %v91_v12 = vld [vmem:[%s375_s1 + $0xa0] sm:$0xff]  ;;  %v90_v14 = vld [vmem:[%s375_s1 + $0x98] sm:$0xff]  ;;  %v81_v16 = vld [vmem:[%s375_s1 + $0x50] sm:$0xff] }
   0x6   :  { %21 = vst.msk [vmem:[#allocation2 + $0x20] sm:$0xf] %vm20_vm1, %v237_v0  ;;  %112 = vmatpush.msra.mxu0 %v84_v7  ;;  %197 = vmatpush.msra.mxu2 %v84_v7  ;;  %v89_v17 = vld [vmem:[%s375_s1 + $0x90] sm:$0xff]  ;;  %v80_v18 = vld [vmem:[%s375_s1 + $0x48] sm:$0xff]  ;;  %v79_v21 = vld [vmem:[%s375_s1 + $0x40] sm:$0xff] }
   0x7   :  { %28 = vst.msk [vmem:[#allocation2 + $0x9] sm:$0xff] %vm15_vm0, %v23_v6  ;;  %152 = vmatpush.msra.mxu1 %v92_v9  ;;  %198 = vmatpush.msra.mxu3 %v84_v7  ;;  %v88_v19 = vld [vmem:[%s375_s1 + $0x88] sm:$0xff]  ;;  %v87_v22 = vld [vmem:[%s375_s1 + $0x80] sm:$0xff]  ;;  %v78_v24 = vld [vmem:[%s375_s1 + $0x38] sm:$0xff] }
   0x8   :  { %29 = vst.msk [vmem:[#allocation2 + $0x13] sm:$0xff] %vm15_vm0, %v24_v8  ;;  %113 = vmatpush.msra.mxu0 %v83_v11  ;;  %199 = vmatpush.msra.mxu2 %v83_v11  ;;  %v77_v27 = vld [vmem:[%s375_s1 + $0x30] sm:$0xff]  ;;  %v76_v30 = vld [vmem:[%s375_s1 + $0x28] sm:$0xff]  ;;  %v75_v31 = vld [vmem:[%s375_s1 + $0x20] sm:$0xff] }
   0x9   :  { %30 = vst.msk [vmem:[#allocation2 + $0x1b] sm:$0xff] %vm15_vm0, %v25_v10  ;;  %153 = vmatpush.msra.mxu1 %v91_v12  ;;  %200 = vmatpush.msra.mxu3 %v83_v11  ;;  %v74_v33 = vld [vmem:[%s375_s1 + $0x18] sm:$0xff]  ;;  %v73_v35 = vld [vmem:[%s375_s1 + $0x10] sm:$0xff]  ;;  %v72_v36 = vld [vmem:[%s375_s1 + $0x8] sm:$0xff] }
   0xa   :  { %v36_v15 = vld [vmem:[#allocation2 + $0x1] sm:$0xff]  ;;  %114 = vmatpush.msra.mxu0 %v82_v13  ;;  %201 = vmatpush.msra.mxu2 %v82_v13 }
   0xb   :  { %51 = vrot.lane.b32.xlu1 %v36_v15, %s238_s10  ;;  %154 = vmatpush.msra.mxu1 %v90_v14  ;;  %v71_v37 = vld [vmem:[%s375_s1] sm:$0xff] }
   0xc   :  { %115 = vmatpush.msra.mxu0 %v81_v16  ;;  %202 = vmatpush.msra.mxu3 %v82_v13  ;;  %v31_v41 = vld [vmem:[#allocation2] sm:$0xff] }
   0xd   :  { %155 = vmatpush.msra.mxu1 %v89_v17  ;;  %203 = vmatpush.msra.mxu2 %v81_v16 }
   0xe   :  { %v37_v20 = vld [vmem:[#allocation2 + $0x9] sm:$0xff]  ;;  %116 = vmatpush.msra.mxu0 %v80_v18  ;;  %204 = vmatpush.msra.mxu3 %v81_v16 }
   0xf   :  { %156 = vmatpush.msra.mxu1 %v88_v19  ;;  %205 = vmatpush.msra.mxu2 %v80_v18  ;;  %v41_v26 = vld [vmem:[#allocation2 + $0x2] sm:$0xff]  ;;  %v38_v28 = vld [vmem:[#allocation2 + $0x11] sm:$0xff] }
  0x10   :  { %v39_v23 = vld [vmem:[#allocation2 + $0x19] sm:$0xff]  ;;  %117 = vmatpush.msra.mxu0 %v79_v21  ;;  %206 = vmatpush.msra.mxu3 %v80_v18  ;;  %v40_v29 = vld [vmem:[#allocation2 + $0x21] sm:$0x3]  ;;  %v42_v34 = vld [vmem:[#allocation2 + $0xa] sm:$0xff] }
  0x11   :  { %v227_v25 = vpack.i.bf16 %v39_v23, %v37_v20  ;;  %157 = vmatpush.msra.mxu1 %v87_v22  ;;  %207 = vmatpush.msra.mxu2 %v79_v21  ;;  %v232_v32 = vpack.i.bf16 %v40_v29, %v38_v28  ;;  %v43_v38 = vld [vmem:[#allocation2 + $0x12] sm:$0xff]  ;;  %v44_v39 = vld [vmem:[#allocation2 + $0x1a] sm:$0xff]  ;;  %v45_v40 = vld [vmem:[#allocation2 + $0x22] sm:$0x3] }
  0x12   :  { %118 = vmatpush.msra.mxu0 %v78_v24  ;;  %188 = vmatmul.msk.f32.vlgmr.msra.gmra.mxu1 %vm15_vm0, %v41_v26  ;;  %v32_v45 = vld [vmem:[#allocation2 + $0x8] sm:$0xff]  ;;  %v34_v46 = vld [vmem:[#allocation2 + $0x18] sm:$0xff]  ;;  %v33_v52 = vld [vmem:[#allocation2 + $0x10] sm:$0xff] }
  0x13   :  { %228 = vrot.lane.b32.xlu0 %v227_v25, %s238_s10  ;;  %208 = vmatpush.msra.mxu3 %v79_v21  ;;  %v35_v53 = vld [vmem:[#allocation2 + $0x20] sm:$0x3] }
  0x14   :  { %119 = vmatpush.msra.mxu0 %v77_v27  ;;  %209 = vmatpush.msra.mxu2 %v78_v24 }
  0x15   :  { %210 = vmatpush.msra.mxu3 %v78_v24 }
  0x16   :  { %120 = vmatpush.msra.mxu0 %v76_v30  ;;  %211 = vmatpush.msra.mxu2 %v77_v27 }
  0x17   :  { %212 = vmatpush.msra.mxu3 %v77_v27 }
  0x18   :  { %121 = vmatpush.msra.mxu0 %v75_v31  ;;  %213 = vmatpush.msra.mxu2 %v76_v30 }
  0x19   :  { %214 = vmatpush.msra.mxu3 %v76_v30 }
  0x1a   :  { %122 = vmatpush.msra.mxu0 %v74_v33  ;;  %189 = vmatmul.msk.f32.gmra.mxu1 %vm15_vm0, %v42_v34 }
  0x1b   :  { %233 = vrot.lane.b32.xlu0 %v232_v32, %s238_s10  ;;  %215 = vmatpush.msra.mxu2 %v75_v31 }
  0x1c   :  { %216 = vmatpush.msra.mxu3 %v75_v31  ;;  %123 = vmatpush.msra.mxu0 %v73_v35 }
  0x1d   :  { %217 = vmatpush.msra.mxu2 %v74_v33 }
  0x1e   :  { %218 = vmatpush.msra.mxu3 %v74_v33  ;;  %124 = vmatpush.msra.mxu0 %v72_v36 }
  0x1f   :  { %219 = vmatpush.msra.mxu2 %v73_v35 }
  0x20   :  { %220 = vmatpush.msra.mxu3 %v73_v35  ;;  %125 = vmatpush.msra.mxu0 %v71_v37 }
  0x21   :  { %221 = vmatpush.msra.mxu2 %v72_v36 }
  0x22   :  { %222 = vmatpush.msra.mxu3 %v72_v36  ;;  %190 = vmatmul.msk.f32.gmra.mxu1 %vm15_vm0, %v43_v38 }
  0x23   :  { %223 = vmatpush.msra.mxu2 %v71_v37 }
  0x24   :  { %224 = vmatpush.msra.mxu3 %v71_v37 }
  0x2a   :  { %191 = vmatmul.msk.f32.gmra.mxu1 %vm15_vm0, %v44_v39 }
  0x32   :  { %192 = vmatmul.msk.f32.gmra.mxu1 %vm15_vm0, %v45_v40 }
  0x7d   :  { %v52_v42 = vpop.permute.xlu1 %51 }
  0x7e   :  { %v66_v43 = vsel %vm15_vm0, %v31_v41, %v52_v42 }
  0x7f   :  { %126 = vmatmul.f32.vlgmr.msra.gmra.mxu0 %v66_v43 }
  0x85   :  { %v229_v44 = vpop.permute.xlu0 %228 }
  0x86   :  { %v231_v47 = vunpack.i.h.bf16 %v229_v44  ;;  %v230_v48 = vunpack.i.l.bf16 %v229_v44 }
  0x88   :  { %v67_v49 = vsel %vm15_vm0, %v32_v45, %v230_v48  ;;  %v69_v50 = vsel %vm15_vm0, %v34_v46, %v231_v47 }
  0x89   :  { %129 = vmatmul.f32.vlgmr.msra.gmra.mxu2 %v67_v49  ;;  %135 = vmatmul.f32.vlgmr.msra.gmra.mxu3 %v69_v50 }
  0x8d   :  { %v234_v51 = vpop.permute.xlu0 %233 }
  0x8e   :  { %v236_v54 = vunpack.i.h.bf16 %v234_v51  ;;  %v235_v55 = vunpack.i.l.bf16 %v234_v51 }
  0x8f   :  { %v159_v58 = vpop.f32.mrf.mxu1 }
  0x90   :  { %v68_v56 = vsel %vm15_vm0, %v33_v52, %v235_v55  ;;  %v70_v57 = vsel %vm15_vm0, %v35_v53, %v236_v54 }
  0x91   :  { %132 = vmatmul.f32.gmra.mxu2 %v68_v56  ;;  %138 = vmatmul.f32.gmra.mxu3 %v70_v57 }
  0x97   :  { %v162_v59 = vpop.f32.mrf.mxu1 }
  0x9f   :  { %v165_v62 = vpop.f32.mrf.mxu1 }
  0xa7   :  { %v168_v0 = vpop.f32.mrf.mxu1 }
  0xaf   :  { %v171_v7 = vpop.f32.mrf.mxu1 }
  0xfc   :  { %v127_v60 = vpop.f32.mrf.mxu0 }
  0xfd   :  { %v160_v61 = vadd.f32 %v159_v58, %v127_v60 }
  0xff   :  { %v174_v63 = vmax.f32 %v160_v61, 0.0 }
 0x101   :  { %179 = vst [vmem:[%s376_s2] sm:$0xff] %v174_v63 }
 0x10c   :  { %v130_v1 = vpop.f32.mrf.mxu2  ;;  %v136_v2 = vpop.f32.mrf.mxu3 }
 0x10d   :  { %v163_v3 = vadd.f32 %v162_v59, %v130_v1  ;;  %v169_v4 = vadd.f32 %v168_v0, %v136_v2 }
 0x10f   :  { %v175_v5 = vmax.f32 %v163_v3, 0.0  ;;  %v177_v6 = vmax.f32 %v169_v4, 0.0 }
 0x111   :  { %180 = vst [vmem:[%s376_s2 + $0x8] sm:$0xff] %v175_v5 }
 0x112   :  { %182 = vst [vmem:[%s376_s2 + $0x16] sm:$0xff] %v177_v6 }
 0x114   :  { %v133_v8 = vpop.f32.mrf.mxu2  ;;  %v139_v9 = vpop.f32.mrf.mxu3 }
 0x115   :  { %v166_v10 = vadd.f32 %v165_v62, %v133_v8  ;;  %v172_v11 = vadd.f32 %v171_v7, %v139_v9 }
 0x117   :  { %v176_v12 = vmax.f32 %v166_v10, 0.0  ;;  %v178_v13 = vmax.f32 %v172_v11, 0.0 }
 0x119   :  { %181 = vst [vmem:[%s376_s2 + $0xe] sm:$0xfc] %v176_v12 }
 0x11a   :  { %183 = vst [vmem:[%s376_s2 + $0x1e] sm:$0x3] %v178_v13 }

</bundles_post_ra>
